<compile_context>
chip_gen: v5e
topology: v5e:2x2
jax: 0.10.0
libtpu: 0.0.40
codegen_flags: <defaults>
</compile_context>

<pallas_src>
import jax
import jax.numpy as jnp
from jax.experimental import pallas as pl
from jax.experimental.pallas import tpu as pltpu


# Sublane packing per dtype byte-width (f32 -> 8, bf16 -> 16, int8/fp8 -> 32).
_SUBLANE_FOR_ITEMSIZE = {1: 32, 2: 16, 4: 8}


def _cdiv(a: int, b: int) -> int:
    return -(-a // b)


def _round_up(x: int, m: int) -> int:
    return _cdiv(x, m) * m


def _even_tile(dim: int, max_tile: int, align: int) -> int:
    """Aligned tile <= ~max_tile that splits `dim` into near-equal chunks.

    Avoids the fixed-tile failure mode where the trailing tile is mostly
    masked stores + wasted input reads (e.g. l_out=1100 with tl=1024).
    """
    max_tile = max(align, _round_up(max_tile, align))
    if dim <= max_tile:
        return _round_up(dim, align)
    n_tiles = _cdiv(dim, max_tile)
    return _round_up(_cdiv(dim, n_tiles), align)


def _chomp_copy_kernel(x_ref, o_ref):
    # Pure tile copy: in/out blocks have identical shapes at identical offsets.
    o_ref[...] = x_ref[...]


def _chomp_dma_kernel(x_hbm, o_hbm, sem):
    # Single strided HBM->HBM DMA of the kept prefix; the core only issues
    # the descriptor and waits — the DMA engine does the whole copy.
    l_out = o_hbm.shape[-1]
    cp = pltpu.make_async_copy(x_hbm.at[:, :l_out], o_hbm, sem)
    cp.start()
    cp.wait()


def chomp1d(x: jax.Array, chomp_size: int, *, tile_rows: int = 512,
            tile_lanes: int = 2048, prefer_dma: bool | None = None) -> jax.Array:
    """x: (N, C, L) -> (N, C, L - chomp_size); identical to x[:, :, :-chomp_size]."""
    n, c, l = x.shape
    assert 0 <= chomp_size < l, "require 0 <= chomp_size < L"
    if chomp_size == 0:
        # TCN semantics: padding == 0 means "remove nothing".  (The literal
        # Python slice `:-0` would be empty; the module is only constructed
        # with chomp_size = padding >= 1 in the TCN.)
        return x

    l_out = l - chomp_size
    rows = n * c
    itemsize = jnp.dtype(x.dtype).itemsize
    sublane = _SUBLANE_FOR_ITEMSIZE.get(itemsize, 8)

    # Free leading-dim merge for contiguous NCL input.  If x ever arrives
    # with a non-default layout, XLA must materialize a full copy here —
    # standardize the layout upstream instead of paying an extra HBM pass.
    x2 = x.reshape(rows, l)

    cost = pl.CostEstimate(
        flops=0,
        transcendentals=0,
        bytes_accessed=2 * rows * l_out * itemsize,  # one read + one write
    )

    if prefer_dma is None:
        # Direct HBM->HBM DMA only when each row moves >= 512 B (efficient
        # strided descriptors) and the kept prefix is lane-tile aligned.
        prefer_dma = (l_out * itemsize >= 512 and l_out % 128 == 0
                      and rows % sublane == 0)

    if prefer_dma:
        out2 = pl.pallas_call(
            _chomp_dma_kernel,
            out_shape=jax.ShapeDtypeStruct((rows, l_out), x.dtype),
            in_specs=[pl.BlockSpec(memory_space=pl.ANY)],
            out_specs=pl.BlockSpec(memory_space=pl.ANY),
            scratch_shapes=[pltpu.SemaphoreType.DMA],
            cost_estimate=cost,
        )(x2)
        return out2.reshape(n, c, l_out)

    # ---------------- tiled, auto-pipelined path ----------------
    # ~4 MiB blocks for any dtype: scale the row budget by 4 / itemsize
    # (f32 -> 512 rows, bf16 -> 1024, int8 -> 2048 at 2048 lanes).
    row_budget = max(sublane, tile_rows * max(1, 4 // itemsize))
    lane_budget = max(128, tile_lanes)

    tm = _even_tile(rows, row_budget, sublane)
    tl = _even_tile(l_out, lane_budget, 128)

    # Keep the double-buffered footprint (2 in + 2 out buffers) under ~24 MiB:
    # safe on v7x (64 MiB physical / 32 MiB default scoped) and leaves slack.
    vmem_budget = 24 << 20
    while 4 * tm * tl * itemsize > vmem_budget and tl > 512:
        tl = _even_tile(l_out, tl // 2, 128)
    while 4 * tm * tl * itemsize > vmem_budget and tm > 8 * sublane:
        tm = _even_tile(rows, tm // 2, sublane)

    # Guarantee >= 2 grid blocks along a "parallel" axis whenever the array
    # is big enough to split, so both v7x TensorCores get work.
    if _cdiv(rows, tm) * _cdiv(l_out, tl) < 2:
        if rows > sublane:
            tm = _round_up(_cdiv(rows, 2), sublane)
        elif l_out > 128:
            tl = _round_up(_cdiv(l_out, 2), 128)

    grid = (_cdiv(rows, tm), _cdiv(l_out, tl))
    block_bytes = tm * tl * itemsize
    # Explicit scoped-VMEM limit: ~4 buffers + slack; also lifts v5e's 16 MiB
    # default when 4 MiB blocks are in play.
    vmem_limit = min(40 << 20, max(16 << 20, 4 * block_bytes + (8 << 20)))

    out2 = pl.pallas_call(
        _chomp_copy_kernel,
        out_shape=jax.ShapeDtypeStruct((rows, l_out), x.dtype),
        grid_spec=pltpu.PrefetchScalarGridSpec(
            num_scalar_prefetch=0,
            grid=grid,
            # Same block shape + same index_map for input and output: the
            # chomp is expressed purely by indexing the input with output
            # coordinates (every output offset is a valid input offset).
            # Possible further sweep: pipeline_mode=pl.Buffered(3) on the
            # input spec for very long grids (low single-digit %).
            in_specs=[pl.BlockSpec((tm, tl), lambda i, j: (i, j))],
            out_specs=pl.BlockSpec((tm, tl), lambda i, j: (i, j)),
        ),
        compiler_params=pltpu.CompilerParams(
            dimension_semantics=("parallel", "parallel"),
            vmem_limit_bytes=vmem_limit,
        ),
        cost_estimate=cost,
    )(x2)
    return out2.reshape(n, c, l_out)


if __name__ == "__main__":
    key = jax.random.PRNGKey(0)
    k1, k2, k3 = jax.random.split(key, 3)

    # Small shapes consistent with the TCN module: (batch, channels, length).
    N, C, L = 2, 4, 16
    chomp = 3  # Chomp1d(chomp_size=3)

    # f32, tiled path (short sequence).
    x = jax.random.normal(k1, (N, C, L), dtype=jnp.float32)
    out = jax.block_until_ready(chomp1d(x, chomp))
    ref = x[:, :, :-chomp]
    assert out.shape == (N, C, L - chomp), out.shape
    assert jnp.array_equal(out, ref), "f32 mismatch with reference slice"

    # bf16, tiled path (exercises 16-sublane packing).
    xb = jax.random.normal(k2, (N, C, L), dtype=jnp.bfloat16)
    outb = jax.block_until_ready(chomp1d(xb, chomp))
    assert jnp.array_equal(outb, xb[:, :, :-chomp]), "bf16 mismatch"

    # Longer sequence: exercises the direct HBM->HBM DMA fast path
    # (l_out = 256 is lane-aligned and >= 512 B per row).
    x3 = jax.random.normal(k3, (2, 8, 259), dtype=jnp.float32)
    out3 = jax.block_until_ready(chomp1d(x3, 3))
    assert out3.shape == (2, 8, 256), out3.shape
    assert jnp.array_equal(out3, x3[:, :, :-3]), "DMA-path mismatch"

    # Same shape forced through the tiled path: exercises the adaptive tiling
    # and the >=2-block megacore guard (grid splits the row axis).
    out4 = jax.block_until_ready(chomp1d(x3, 3, prefer_dma=False))
    assert jnp.array_equal(out4, x3[:, :, :-3]), "tiled multi-block mismatch"

    print("KERNEL_OK")
</pallas_src>

<mosaic_0001>
module attributes {stable_mosaic.version = 11 : i64} {
  func.func @_chomp_copy_kernel(%arg0: i32, %arg1: i32, %arg2: memref<8x128xf32, #tpu.memory_space<vmem>>, %arg3: memref<8x128xf32, #tpu.memory_space<vmem>>) attributes {dimension_semantics = [#tpu.dimension_semantics<parallel>, #tpu.dimension_semantics<parallel>], iteration_bounds = array<i64: 1, 1>, scalar_prefetch = 0 : i64, scratch_operands = 0 : i64, tpu.core_type = #tpu.core_type<tc>, window_params = [{transform_indices = @transform_0, window_bounds = array<i64: 8, 128>}, {transform_indices = @transform_1, window_bounds = array<i64: 8, 128>}]} {
    %c0 = arith.constant 0 : index
    %c0_0 = arith.constant 0 : index
    %0 = vector.load %arg2[%c0, %c0_0] : memref<8x128xf32, #tpu.memory_space<vmem>>, vector<8x128xf32>
    %c0_1 = arith.constant 0 : index
    %c0_2 = arith.constant 0 : index
    %1 = vector.load %arg3[%c0_1, %c0_2] : memref<8x128xf32, #tpu.memory_space<vmem>>, vector<8x128xf32>
    tpu.vector_store %arg3[%c0_1, %c0_2], %0 {strides = array<i32>} : memref<8x128xf32, #tpu.memory_space<vmem>>, vector<8x128xf32>,
    return
  }
  func.func @transform_0(%arg0: i32, %arg1: i32) -> (i32, i32) {
    %c0_i32 = arith.constant 0 : i32
    return %arg0, %arg1 : i32, i32
  }
  func.func @transform_1(%arg0: i32, %arg1: i32) -> (i32, i32) {
    %c0_i32 = arith.constant 0 : i32
    return %arg0, %arg1 : i32, i32
  }
}

</mosaic_0001>

<bundles_post_ra>
// kernel: tpu_custom_call.1
= control target key start
LH: loop header
LB: loop body
LE: loop exit
PB: predicated region body
PF: predicated region fallthrough
CT: control target
= control target key end

     0   :  { %6 = vsyncpa [#allocation3], 0  ;;  %s114_s0 = inlined_call_operand.hbm [shape: f32[8,16], index: 0, kind: input, shape index: {}]   ;;  %s115_s1 = inlined_call_operand.hbm [shape: f32[8,13], index: 1, kind: output, shape index: {}]  }
   0x1   :  { %7 = vsyncpa [#allocation4], 0  ;;  %s13_s8 = sshll.u32 %s114_s0, 4  ;;  %s96_s9 = smov [#allocation2]   ;;  %s14_s8 = int_to_ptr.hbm [resolvable:$true] %s13_s8 }
   0x2   :  { %s15_s10 = sshll.u32 %s96_s9, 4  ;;  %s16_s10 = int_to_ptr.vmem [resolvable:$true] %s15_s10 }
   0x3   :  { %18 = dma.hbm_to_vmem [thread:$0]  %s14_s8, 128, %s16_s10, [#allocation3]  }
   0x4   :  { %92 = dma.done.wait [#allocation3], 128  }
   0x5   :  { %93 = vsyncadd [#allocation3], 4294967168  ;;  %s97_s11 = smov [#allocation5]   ;;  %s32_s15 = sshll.u32 %s115_s1, 4  ;;  %v23_v0 = vld [vmem:[#allocation2] sm:$0xff]  ;;  %s33_s15 = int_to_ptr.hbm [resolvable:$true] %s32_s15 }
   0x6   :  { %s30_s12 = sshll.u32 %s97_s11, 4  ;;  %24 = vst [vmem:[#allocation5] sm:$0xff] %v23_v0  ;;  %s31_s12 = int_to_ptr.vmem [resolvable:$true] %s30_s12 }
   0x7   :  { %35 = dma.vmem_to_hbm [thread:$0]  %s31_s12, 128, %s33_s15, [#allocation4]  }
   0x8   :  { %94 = dma.done.wait [#allocation4], 128  }
   0x9   :  { %95 = vsyncadd [#allocation4], 4294967168 }
   0xa   :  { %40 = vsyncpa [#allocation3], 1 }
   0xb   :  { %41 = vsyncpa [#allocation4], 1 }

</bundles_post_ra>
